<compile_context>
chip_gen: v6e
topology: v6e:2x2x1
jax: 0.10.0
libtpu: 0.0.40
codegen_flags: <defaults>
</compile_context>

<pallas_src>
import jax
import jax.numpy as jnp
from jax.experimental import pallas as pl
from jax.experimental.pallas import tpu as pltpu

NEG_SLOPE = 0.01  # nn.LeakyReLU() default negative_slope
OUT_LANES = 128   # lane-dense output width (real out_dim=2 is sliced out in the wrapper)


def _leaky_relu(x):
    return jnp.where(x >= 0, x, NEG_SLOPE * x)


def mlp_kernel(x_ref, w1_ref, b1_ref, w2_ref, b2_ref, w3_ref, b3_ref, o_ref):
    # Hidden layer 1: Linear + LeakyReLU (f32 accumulation on the MXU)
    h = jnp.dot(x_ref[...], w1_ref[...], preferred_element_type=jnp.float32)
    h = _leaky_relu(h + b1_ref[...])
    # Hidden layer 2: Linear + LeakyReLU
    h = jnp.dot(h, w2_ref[...], preferred_element_type=jnp.float32)
    h = _leaky_relu(h + b2_ref[...])
    # Output layer: Linear (no activation). w3/b3 are lane-padded to 128 columns,
    # so this store is a full-lane (unmasked) vst.
    o_ref[...] = jnp.dot(h, w3_ref[...], preferred_element_type=jnp.float32) + b3_ref[...]


def size_predictor_forward(x, params, *, tile_b=None):
    """Run the SizePredictor MLP with a single fused Pallas kernel.

    Small batches (<= 512 rows) run as a single grid step (no pipeline overhead);
    larger batches are tiled over rows with a big MXU-filling tile.
    """
    (w1, b1), (w2, b2), (w3, b3) = params
    B, ctrl = x.shape
    h1 = w1.shape[1]
    h2 = w2.shape[1]
    out_dim = w3.shape[1]
    assert out_dim <= OUT_LANES

    # Lane-dense final layer: zero-pad weight columns / bias entries to 128 lanes.
    # Zero columns produce zero outputs, which are sliced off below.
    w3p = jnp.pad(w3, ((0, 0), (0, OUT_LANES - out_dim)))
    b3p = jnp.pad(b3, ((0, 0), (0, OUT_LANES - out_dim)))

    # Pick the batch tile: whole batch in one shot when small, else >=128-row tiles.
    if tile_b is None:
        tile_b = B if B <= 512 else 512
    num_tiles = pl.cdiv(B, tile_b)
    Bp = num_tiles * tile_b
    if Bp != B:
        x = jnp.pad(x, ((0, Bp - B), (0, 0)))

    grid = (num_tiles,)

    # x / out are tiled over the batch axis; weights & biases are resident
    # (constant index_map => same block every step; with grid=(1,) this is a
    # single DMA each, so no extra buffering knobs are needed).
    in_specs = [
        pl.BlockSpec((tile_b, ctrl), lambda i: (i, 0)),
        pl.BlockSpec((ctrl, h1), lambda i: (0, 0)),
        pl.BlockSpec((1, h1), lambda i: (0, 0)),
        pl.BlockSpec((h1, h2), lambda i: (0, 0)),
        pl.BlockSpec((1, h2), lambda i: (0, 0)),
        pl.BlockSpec((h2, OUT_LANES), lambda i: (0, 0)),
        pl.BlockSpec((1, OUT_LANES), lambda i: (0, 0)),
    ]
    out_specs = pl.BlockSpec((tile_b, OUT_LANES), lambda i: (i, 0))

    # Only bother with megacore sharding hints when there is more than one step.
    compiler_params = (
        pltpu.CompilerParams(dimension_semantics=("parallel",))
        if num_tiles > 1
        else None
    )

    out_full = pl.pallas_call(
        mlp_kernel,
        out_shape=jax.ShapeDtypeStruct((Bp, OUT_LANES), jnp.float32),
        grid=grid,
        in_specs=in_specs,
        out_specs=out_specs,
        compiler_params=compiler_params,
    )(x, w1, b1, w2, b2, w3p, b3p)

    # Strip batch padding and the lane padding of the output layer.
    return out_full[:B, :out_dim]


def init_params(key, ctrl, hidden, out_dim=2):
    """Deterministic PyTorch-style init: U(-1/sqrt(fan_in), 1/sqrt(fan_in))."""
    dims = [ctrl] + list(hidden) + [out_dim]
    params = []
    for i in range(len(dims) - 1):
        fan_in, fan_out = dims[i], dims[i + 1]
        key, kw, kb = jax.random.split(key, 3)
        bound = 1.0 / (fan_in ** 0.5)
        w = jax.random.uniform(kw, (fan_in, fan_out), jnp.float32, -bound, bound)
        b = jax.random.uniform(kb, (1, fan_out), jnp.float32, -bound, bound)
        params.append((w, b))
    return params


def reference_forward(x, params):
    (w1, b1), (w2, b2), (w3, b3) = params
    h = _leaky_relu(x @ w1 + b1)
    h = _leaky_relu(h @ w2 + b2)
    return h @ w3 + b3


if __name__ == "__main__":
    key = jax.random.PRNGKey(0)
    batch, ctrl = 16, 32
    hidden = [64, 32]

    kx, kp = jax.random.split(key)
    x = jax.random.normal(kx, (batch, ctrl), dtype=jnp.float32)
    params = init_params(kp, ctrl, hidden, out_dim=2)

    out = size_predictor_forward(x, params)
    out = jax.block_until_ready(out)

    ref = reference_forward(x, params)
    assert out.shape == (batch, 2)
    assert jnp.allclose(out, ref, atol=1e-5, rtol=1e-5)

    print("KERNEL_OK")
</pallas_src>

<mosaic_0001>
module attributes {stable_mosaic.version = 11 : i64} {
  func.func @mlp_kernel(%arg0: i32, %arg1: memref<16x32xf32, #tpu.memory_space<vmem>>, %arg2: memref<32x64xf32, #tpu.memory_space<vmem>>, %arg3: memref<1x64xf32, #tpu.memory_space<vmem>>, %arg4: memref<64x32xf32, #tpu.memory_space<vmem>>, %arg5: memref<1x32xf32, #tpu.memory_space<vmem>>, %arg6: memref<32x128xf32, #tpu.memory_space<vmem>>, %arg7: memref<1x128xf32, #tpu.memory_space<vmem>>, %arg8: memref<16x128xf32, #tpu.memory_space<vmem>>) attributes {dimension_semantics = [#tpu.dimension_semantics<arbitrary>], iteration_bounds = array<i64: 1>, scalar_prefetch = 0 : i64, scratch_operands = 0 : i64, tpu.core_type = #tpu.core_type<tc>, window_params = [{transform_indices = @transform_0, window_bounds = array<i64: 16, 32>}, {pipeline_mode = #tpu.pipeline_mode<synchronous>, transform_indices = @transform_1, window_bounds = array<i64: 32, 64>}, {pipeline_mode = #tpu.pipeline_mode<synchronous>, transform_indices = @transform_2, window_bounds = array<i64: 1, 64>}, {pipeline_mode = #tpu.pipeline_mode<synchronous>, transform_indices = @transform_3, window_bounds = array<i64: 64, 32>}, {pipeline_mode = #tpu.pipeline_mode<synchronous>, transform_indices = @transform_4, window_bounds = array<i64: 1, 32>}, {pipeline_mode = #tpu.pipeline_mode<synchronous>, transform_indices = @transform_5, window_bounds = array<i64: 32, 128>}, {pipeline_mode = #tpu.pipeline_mode<synchronous>, transform_indices = @transform_6, window_bounds = array<i64: 1, 128>}, {transform_indices = @transform_7, window_bounds = array<i64: 16, 128>}]} {
    %c0 = arith.constant 0 : index
    %c0_0 = arith.constant 0 : index
    %0 = vector.load %arg1[%c0, %c0_0] : memref<16x32xf32, #tpu.memory_space<vmem>>, vector<16x32xf32>
    %c0_1 = arith.constant 0 : index
    %c0_2 = arith.constant 0 : index
    %1 = vector.load %arg2[%c0_1, %c0_2] : memref<32x64xf32, #tpu.memory_space<vmem>>, vector<32x64xf32>
    %cst = arith.constant dense<0.000000e+00> : vector<16x64xf32>
    %2 = tpu.matmul %0, %1, %cst {dimension_numbers = #tpu.dot_dimension_numbers<[1], [0], [0], [1], [0, 0, 1, 1], [], []>} : vector<16x32xf32>, vector<32x64xf32>, vector<16x64xf32> -> vector<16x64xf32>
    %c0_3 = arith.constant 0 : index
    %c0_4 = arith.constant 0 : index
    %3 = vector.load %arg3[%c0_3, %c0_4] : memref<1x64xf32, #tpu.memory_space<vmem>>, vector<1x64xf32>
    %4 = vector.broadcast %3 : vector<1x64xf32> to vector<16x64xf32>
    %5 = arith.addf %2, %4 : vector<16x64xf32>
    %cst_5 = arith.constant 0.000000e+00 : f32
    %6 = vector.broadcast %cst_5 : f32 to vector<16x64xf32>
    %7 = arith.cmpf oge, %5, %6 : vector<16x64xf32>
    %cst_6 = arith.constant 0.00999999977 : f32
    %8 = vector.broadcast %cst_6 : f32 to vector<16x64xf32>
    %9 = arith.mulf %8, %5 : vector<16x64xf32>
    %10 = arith.select %7, %5, %9 : vector<16x64xi1>, vector<16x64xf32>
    %c0_7 = arith.constant 0 : index
    %c0_8 = arith.constant 0 : index
    %11 = vector.load %arg4[%c0_7, %c0_8] : memref<64x32xf32, #tpu.memory_space<vmem>>, vector<64x32xf32>
    %cst_9 = arith.constant dense<0.000000e+00> : vector<16x32xf32>
    %12 = tpu.matmul %10, %11, %cst_9 {dimension_numbers = #tpu.dot_dimension_numbers<[1], [0], [0], [1], [0, 0, 1, 1], [], []>} : vector<16x64xf32>, vector<64x32xf32>, vector<16x32xf32> -> vector<16x32xf32>
    %c0_10 = arith.constant 0 : index
    %c0_11 = arith.constant 0 : index
    %13 = vector.load %arg5[%c0_10, %c0_11] : memref<1x32xf32, #tpu.memory_space<vmem>>, vector<1x32xf32>
    %14 = vector.broadcast %13 : vector<1x32xf32> to vector<16x32xf32>
    %15 = arith.addf %12, %14 : vector<16x32xf32>
    %cst_12 = arith.constant 0.000000e+00 : f32
    %16 = vector.broadcast %cst_12 : f32 to vector<16x32xf32>
    %17 = arith.cmpf oge, %15, %16 : vector<16x32xf32>
    %cst_13 = arith.constant 0.00999999977 : f32
    %18 = vector.broadcast %cst_13 : f32 to vector<16x32xf32>
    %19 = arith.mulf %18, %15 : vector<16x32xf32>
    %20 = arith.select %17, %15, %19 : vector<16x32xi1>, vector<16x32xf32>
    %c0_14 = arith.constant 0 : index
    %c0_15 = arith.constant 0 : index
    %21 = vector.load %arg6[%c0_14, %c0_15] : memref<32x128xf32, #tpu.memory_space<vmem>>, vector<32x128xf32>
    %cst_16 = arith.constant dense<0.000000e+00> : vector<16x128xf32>
    %22 = tpu.matmul %20, %21, %cst_16 {dimension_numbers = #tpu.dot_dimension_numbers<[1], [0], [0], [1], [0, 0, 1, 1], [], []>} : vector<16x32xf32>, vector<32x128xf32>, vector<16x128xf32> -> vector<16x128xf32>
    %c0_17 = arith.constant 0 : index
    %c0_18 = arith.constant 0 : index
    %23 = vector.load %arg7[%c0_17, %c0_18] : memref<1x128xf32, #tpu.memory_space<vmem>>, vector<1x128xf32>
    %24 = vector.broadcast %23 : vector<1x128xf32> to vector<16x128xf32>
    %25 = arith.addf %22, %24 : vector<16x128xf32>
    %c0_19 = arith.constant 0 : index
    %c0_20 = arith.constant 0 : index
    %26 = vector.load %arg8[%c0_19, %c0_20] : memref<16x128xf32, #tpu.memory_space<vmem>>, vector<16x128xf32>
    tpu.vector_store %arg8[%c0_19, %c0_20], %25 {strides = array<i32>} : memref<16x128xf32, #tpu.memory_space<vmem>>, vector<16x128xf32>,
    return
  }
  func.func @transform_0(%arg0: i32) -> (i32, i32) {
    %c0_i32 = arith.constant 0 : i32
    %c0_i32_0 = arith.constant 0 : i32
    return %arg0, %c0_i32 : i32, i32
  }
  func.func @transform_1(%arg0: i32) -> (i32, i32) {
    %c0_i32 = arith.constant 0 : i32
    %c0_i32_0 = arith.constant 0 : i32
    %c0_i32_1 = arith.constant 0 : i32
    return %c0_i32, %c0_i32_0 : i32, i32
  }
  func.func @transform_2(%arg0: i32) -> (i32, i32) {
    %c0_i32 = arith.constant 0 : i32
    %c0_i32_0 = arith.constant 0 : i32
    %c0_i32_1 = arith.constant 0 : i32
    return %c0_i32, %c0_i32_0 : i32, i32
  }
  func.func @transform_3(%arg0: i32) -> (i32, i32) {
    %c0_i32 = arith.constant 0 : i32
    %c0_i32_0 = arith.constant 0 : i32
    %c0_i32_1 = arith.constant 0 : i32
    return %c0_i32, %c0_i32_0 : i32, i32
  }
  func.func @transform_4(%arg0: i32) -> (i32, i32) {
    %c0_i32 = arith.constant 0 : i32
    %c0_i32_0 = arith.constant 0 : i32
    %c0_i32_1 = arith.constant 0 : i32
    return %c0_i32, %c0_i32_0 : i32, i32
  }
  func.func @transform_5(%arg0: i32) -> (i32, i32) {
    %c0_i32 = arith.constant 0 : i32
    %c0_i32_0 = arith.constant 0 : i32
    %c0_i32_1 = arith.constant 0 : i32
    return %c0_i32, %c0_i32_0 : i32, i32
  }
  func.func @transform_6(%arg0: i32) -> (i32, i32) {
    %c0_i32 = arith.constant 0 : i32
    %c0_i32_0 = arith.constant 0 : i32
    %c0_i32_1 = arith.constant 0 : i32
    return %c0_i32, %c0_i32_0 : i32, i32
  }
  func.func @transform_7(%arg0: i32) -> (i32, i32) {
    %c0_i32 = arith.constant 0 : i32
    %c0_i32_0 = arith.constant 0 : i32
    return %arg0, %c0_i32 : i32, i32
  }
}

</mosaic_0001>

<bundles_post_ra>
// kernel: tpu_custom_call.1
= control target key start
LH: loop header
LB: loop body
LE: loop exit
PB: predicated region body
PF: predicated region fallthrough
CT: control target
= control target key end

     0   :  { %vm40_vm0 = vcmask 261120   ;;  %s551_s0 = inlined_call_operand.vmem [shape: f32[16,32], index: 0, kind: input, shape index: {}]   ;;  %s552_s1 = inlined_call_operand.vmem [shape: f32[32,64], index: 1, kind: input, shape index: {}]   ;;  %s553_s2 = inlined_call_operand.vmem [shape: f32[1,64], index: 2, kind: input, shape index: {}]   ;;  %s554_s3 = inlined_call_operand.vmem [shape: f32[64,32], index: 3, kind: input, shape index: {}]   ;;  %s555_s4 = inlined_call_operand.vmem [shape: f32[1,32], index: 4, kind: input, shape index: {}]   ;;  %s556_s5 = inlined_call_operand.vmem [shape: f32[32,128], index: 5, kind: input, shape index: {}]   ;;  %s557_s6 = inlined_call_operand.vmem [shape: f32[1,128], index: 6, kind: input, shape index: {}]   ;;  %s558_s7 = inlined_call_operand.hbm [shape: f32[16,128], index: 7, kind: output, shape index: {}]  }
   0x1   :  { %v32_v0 = vld [vmem:[%s552_s1 + $0x18] sm:$0xff]  ;;  %v31_v1 = vld [vmem:[%s552_s1 + $0x10] sm:$0xff]  ;;  %v27_v2 = vld [vmem:[%s551_s0] sm:$0xff] }
   0x2   :  { %372 = vmatprep.subr.mxu0 %v32_v0  ;;  %v30_v3 = vld [vmem:[%s552_s1 + $0x8] sm:$0xff]  ;;  %380 = vmatprep.mubr.msk.f32.mxu0 %vm40_vm0, %v27_v2  ;;  %v135_v4 = vld [vmem:[%s554_s3 + $0x38] sm:$0xff]  ;;  %v134_v5 = vld [vmem:[%s554_s3 + $0x30] sm:$0xff] }
   0x3   :  { %373 = vmatpush3.msra.mxu0 %v32_v0  ;;  %383 = vmatprep.subr.mxu1 %v135_v4 }
   0x4   :  { %374 = vmatprep.subr.mxu0 %v31_v1 }
   0x5   :  { %12 = vsyncpa [#allocation3], 0  ;;  %375 = vmatpush3.msra.mxu0 %v31_v1  ;;  %v29_v6 = vld [vmem:[%s552_s1] sm:$0xff]  ;;  %384 = vmatpush3.msra.mxu1 %v135_v4  ;;  %v133_v7 = vld [vmem:[%s554_s3 + $0x28] sm:$0xff]  ;;  %vm143_vm3 = vcmask 523264   ;;  %s438_s15 = smov [#allocation2]  }
   0x6   :  { %376 = vmatprep.subr.mxu0 %v30_v3  ;;  %385 = vmatprep.subr.mxu1 %v134_v5  ;;  %v28_v8 = vld [vmem:[%s551_s0 + $0x8] sm:$0xff]  ;;  %v132_v9 = vld [vmem:[%s554_s3 + $0x20] sm:$0xff]  ;;  %v131_v10 = vld [vmem:[%s554_s3 + $0x18] sm:$0xff] }
   0x7   :  { %377 = vmatpush3.msra.mxu0 %v30_v3  ;;  %386 = vmatpush3.msra.mxu1 %v134_v5  ;;  %v130_v11 = vld [vmem:[%s554_s3 + $0x10] sm:$0xff]  ;;  %v129_v12 = vld [vmem:[%s554_s3 + $0x8] sm:$0xff]  ;;  %v128_v13 = vld [vmem:[%s554_s3] sm:$0xff] }
   0x8   :  { %378 = vmatprep.subr.mxu0 %v29_v6  ;;  %387 = vmatprep.subr.mxu1 %v133_v7  ;;  %v341_v14 = vld [vmem:[%s553_s2] ss:$0 sm:$0xff]  ;;  %v234_v23 = vld [vmem:[%s556_s5 + $0x18] sm:$0xff]  ;;  %v233_v24 = vld [vmem:[%s556_s5 + $0x10] sm:$0xff] }
   0x9   :  { %379 = vmatpush3.msra.mxu0 %v29_v6  ;;  %388 = vmatpush3.msra.mxu1 %v133_v7  ;;  %v232_v25 = vld [vmem:[%s556_s5 + $0x8] sm:$0xff]  ;;  %v231_v26 = vld [vmem:[%s556_s5] sm:$0xff] }
   0xa   :  { %381 = vmatmul.mubr.msk.f32.vlgmr.msra.gmra.mxu0 %vm40_vm0, %v28_v8  ;;  %389 = vmatprep.subr.mxu1 %v132_v9  ;;  %v344_v27 = vld [vmem:[%s555_s4] ss:$0 sm:$0xff]  ;;  %s330_s4 = sshll.u32 %s438_s15, 4  ;;  %s331_s4 = int_to_ptr.vmem [resolvable:$true] %s330_s4 }
   0xb   :  { %390 = vmatpush3.msra.mxu1 %v132_v9  ;;  %402 = vmatprep.subr.mxu0 %v234_v23  ;;  %v347_v36 = vld [vmem:[%s557_s6] ss:$0 sm:$0xff]  ;;  %s416_s16 = scalar_lea.vmem %s331_s4, 256  ;;  %p421_p1 = scmp.lt.s32.totalorder %s331_s4, %s331_s4 }
   0xc   :  { %391 = vmatprep.subr.mxu1 %v131_v10  ;;  %403 = vmatpush3.msra.mxu0 %v234_v23  ;;  %p417_p0 = scmp.ne.s32.totalorder %s331_s4, %s416_s16  ;;  %p422_p2 = scmp.lt.s32.totalorder %s416_s16, %s416_s16 }
   0xd   :  { %392 = vmatpush3.msra.mxu1 %v131_v10  ;;  %404 = vmatprep.subr.mxu0 %v233_v24 }
   0xe   :  { %393 = vmatprep.subr.mxu1 %v130_v11  ;;  %405 = vmatpush3.msra.mxu0 %v233_v24  ;;  %p423_p3 = por %p422_p2, %p421_p1 }
   0xf   :  { %394 = vmatpush3.msra.mxu1 %v130_v11  ;;  %406 = vmatprep.subr.mxu0 %v232_v25 }
  0x10   :  { %395 = vmatprep.subr.mxu1 %v129_v12  ;;  %407 = vmatpush3.msra.mxu0 %v232_v25  ;;  %p424_p4 = pnand %p423_p3, %p417_p0 }
  0x11   :  { %396 = vmatpush3.msra.mxu1 %v129_v12  ;;  %408 = vmatprep.subr.mxu0 %v231_v26 }
  0x12   :  { %397 = vmatprep.subr.mxu1 %v128_v13  ;;  %409 = vmatpush3.msra.mxu0 %v231_v26 }
  0x13   :  { %398 = vmatpush3.msra.mxu1 %v128_v13 }
  0xca   :  { %v382_v15 = vpop.f32.mrf.mxu0 }
  0xcb   :  { %v119_v16 = vadd.f32 %v382_v15, %v341_v14 }
  0xcc   :  { %v113_v17 = vpop.f32.mrf.mxu0 }
  0xcd   :  { %v114_v18 = vadd.f32 %v341_v14, %v113_v17  ;;  %v125_v19 = vmul.f32 0.01, %v119_v16  ;;  %vm123_vm1 = vcmp.ge.f32.partialorder %v119_v16, 0.0 }
  0xcf   :  { %vm122_vm2 = vcmp.ge.f32.partialorder %v114_v18, 0.0  ;;  %v124_v20 = vmul.f32 0.01, %v114_v18  ;;  %v127_v22 = vsel %vm123_vm1, %v119_v16, %v125_v19 }
  0xd1   :  { %v126_v21 = vsel %vm122_vm2, %v114_v18, %v124_v20 }
  0xd2   :  { %399 = vmatprep.mubr.msk.f32.mxu1 %vm143_vm3, %v126_v21 }
  0xd3   :  { %400 = vmatmul.mubr.msk.f32.vlgmr.msra.gmra.mxu1 %vm143_vm3, %v127_v22 }
 0x193   :  { %v401_v28 = vpop.f32.mrf.mxu1 }
 0x194   :  { %v222_v29 = vadd.f32 %v401_v28, %v344_v27 }
 0x195   :  { %v216_v30 = vpop.f32.mrf.mxu1 }
 0x196   :  { %v217_v31 = vadd.f32 %v344_v27, %v216_v30  ;;  %v228_v32 = vmul.f32 0.01, %v222_v29  ;;  %vm226_vm4 = vcmp.ge.f32.partialorder %v222_v29, 0.0 }
 0x198   :  { %vm225_vm5 = vcmp.ge.f32.partialorder %v217_v31, 0.0  ;;  %v227_v33 = vmul.f32 0.01, %v217_v31  ;;  %v230_v35 = vsel %vm226_vm4, %v222_v29, %v228_v32 }
 0x19a   :  { %v229_v34 = vsel %vm225_vm5, %v217_v31, %v227_v33 }
 0x19b   :  { %410 = vmatprep.mubr.msk.f32.mxu0 %vm40_vm0, %v229_v34 }
 0x19c   :  { %411 = vmatmul.mubr.msk.f32.vlgmr.msra.gmra.mxu0 %vm40_vm0, %v230_v35 }
 0x25c   :  { %v412_v37 = vpop.f32.mrf.mxu0 }
 0x25d   :  { %v320_v38 = vadd.f32 %v412_v37, %v347_v36 }
 0x25e   :  { %v314_v39 = vpop.f32.mrf.mxu0 }
 0x25f   :  { %324 = vst [vmem:[#allocation2 + $0x8] sm:$0xff] %v320_v38  ;;  %v315_v40 = vadd.f32 %v347_v36, %v314_v39 }
 0x261   :  { %323 = vst [vmem:[#allocation2] sm:$0xff] %v315_v40 }
 0x262   :  { %427 = shalt.err (!%p424_p4)
}
 0x263   :  { %s439_s17 = smov 128   ;;  %s440_s18 = smov 8  }
 0x264   :  { %336 = dma.vmem_to_hbm [thread:$0]  %s331_s4, 256, %s558_s7, [#allocation3], %s439_s17, %s439_s17, %s440_s18  }
 0x265   :  { %436 = dma.done.wait [#allocation3], 256  }
 0x266   :  { %437 = vsyncadd [#allocation3], 4294967040 }
 0x267   :  { %340 = vsyncpa [#allocation3], 1 }

</bundles_post_ra>
